<compile_context>
chip_gen: v6e
topology: v6e:2x2x1
jax: 0.10.0
libtpu: 0.0.40
codegen_flags: <defaults>
</compile_context>

<pallas_src>
import functools

import jax
import jax.numpy as jnp
from jax.experimental import pallas as pl
from jax.experimental.pallas import tpu as pltpu


def _round_up(a, b):
    return ((a + b - 1) // b) * b


def _cdiv(a, b):
    return (a + b - 1) // b


def _mean_pool_fast_kernel(x_ref, o_ref, *, inv_c):
    # x_ref: (1, C, L_tile) — one block covers all channels.
    # o_ref: (1, 1, L_tile)
    s = jnp.sum(x_ref[...].astype(jnp.float32), axis=1, keepdims=True)
    o_ref[...] = (s * inv_c).astype(o_ref.dtype)


def _mean_pool_acc_kernel(x_ref, o_ref, acc_ref, *, inv_c, c_total, c_tile, c_ragged):
    # x_ref:   (1, C_tile, L_tile) input block
    # o_ref:   (1, 1, L_tile) output block (resident across the C grid axis)
    # acc_ref: (1, 1, L_tile) f32 accumulator scratch
    k = pl.program_id(2)

    @pl.when(k == 0)
    def _():
        acc_ref[...] = jnp.zeros_like(acc_ref)

    x = x_ref[...].astype(jnp.float32)
    if c_ragged:
        # Mask channels past the true C (only the last, partial C block has
        # any masked rows; earlier blocks the predicate is all-true).
        ch = jax.lax.broadcasted_iota(jnp.int32, x.shape, 1) + k * c_tile
        x = jnp.where(ch < c_total, x, 0.0)
    acc_ref[...] += jnp.sum(x, axis=1, keepdims=True)

    @pl.when(k == pl.num_programs(2) - 1)
    def _():
        # Single multiply by precomputed 1/C at finalize (divide by true C, so
        # masked/ragged channels are exact).
        o_ref[...] = (acc_ref[...] * inv_c).astype(o_ref.dtype)


def mean_pool(x, *, vmem_in_buf_budget=2 * 1024 * 1024):
    """x: (N, C, H, W) -> (N, H, W), mean over the channel dim (dim=1)."""
    N, C, H, W = x.shape
    L = H * W
    dtype = x.dtype
    itemsize = jnp.dtype(dtype).itemsize
    # Minimum sublane packing multiple per dtype: f32 -> 8, bf16 -> 16, i8 -> 32.
    pack = max(8, 256 // (itemsize * 8))

    # Lane-dense flattened spatial axis. No padding copy: ragged tiles are
    # handled by the cdiv grid (L) and in-kernel masking (C, large-C path).
    x2 = x.reshape(N, C, L)
    inv_c = float(1.0 / C)
    L_ceil = _round_up(max(L, 1), 128)

    def size_l_tile(c_tile):
        lt = max(128, (vmem_in_buf_budget // (c_tile * itemsize)) // 128 * 128)
        return min(lt, L_ceil)

    def split_for_megacore(l_tile):
        # Keep both v7x TensorCores fed: parallel axes (N x L-tiles) >= 2.
        if N * _cdiv(L, l_tile) < 2 and L > 128:
            return min(l_tile, max(128, _round_up(_cdiv(L, 2), 128)))
        return l_tile

    fast = C * 128 * itemsize <= vmem_in_buf_budget

    if fast:
        # Single-pass path: one block covers all channels. C_tile == C equals
        # the full array dim, so no channel padding/alignment is required.
        C_tile = C
        L_tile = split_for_megacore(size_l_tile(C_tile))
        grid = (N, _cdiv(L, L_tile))

        out = pl.pallas_call(
            functools.partial(_mean_pool_fast_kernel, inv_c=inv_c),
            out_shape=jax.ShapeDtypeStruct((N, 1, L), dtype),
            grid_spec=pltpu.PrefetchScalarGridSpec(
                num_scalar_prefetch=0,
                grid=grid,
                in_specs=[
                    pl.BlockSpec((1, C_tile, L_tile), lambda b, l: (b, 0, l)),
                ],
                out_specs=pl.BlockSpec((1, 1, L_tile), lambda b, l: (b, 0, l)),
            ),
            compiler_params=pltpu.CompilerParams(
                dimension_semantics=("parallel", "parallel"),
            ),
        )(x2)
    else:
        # Large-C path: channel reduction on a trailing "arbitrary" grid axis
        # with an f32 VMEM accumulator. C_tile is a multiple of the dtype's
        # sublane packing; the ragged last C block is masked in-kernel.
        l_target = 512
        C_tile = (vmem_in_buf_budget // (l_target * itemsize)) // pack * pack
        C_tile = max(pack, min(C_tile, _round_up(C, pack)))
        L_tile = split_for_megacore(size_l_tile(C_tile))
        grid = (N, _cdiv(L, L_tile), _cdiv(C, C_tile))
        c_ragged = (C % C_tile) != 0

        out = pl.pallas_call(
            functools.partial(
                _mean_pool_acc_kernel,
                inv_c=inv_c,
                c_total=C,
                c_tile=C_tile,
                c_ragged=c_ragged,
            ),
            out_shape=jax.ShapeDtypeStruct((N, 1, L), dtype),
            grid_spec=pltpu.PrefetchScalarGridSpec(
                num_scalar_prefetch=0,
                grid=grid,
                in_specs=[
                    pl.BlockSpec((1, C_tile, L_tile), lambda b, l, k: (b, k, l)),
                ],
                out_specs=pl.BlockSpec((1, 1, L_tile), lambda b, l, k: (b, 0, l)),
                scratch_shapes=[pltpu.VMEM((1, 1, L_tile), jnp.float32)],
            ),
            compiler_params=pltpu.CompilerParams(
                dimension_semantics=("parallel", "parallel", "arbitrary"),
            ),
        )(x2)

    return out[:, 0, :].reshape(N, H, W)


if __name__ == "__main__":
    key = jax.random.PRNGKey(0)
    # Small NCHW input consistent with the module's forward.
    x = jax.random.normal(key, (2, 4, 16, 16), dtype=jnp.float32)

    out = mean_pool(x)
    out = jax.block_until_ready(out)

    # Pure-JAX reference (x.mean(dim=1) semantics).
    ref = jnp.mean(x, axis=1)
    assert out.shape == ref.shape == (2, 16, 16), (out.shape, ref.shape)
    assert jnp.allclose(out, ref, atol=1e-5, rtol=1e-5)

    print("KERNEL_OK")
</pallas_src>

<mosaic_0001>
module attributes {stable_mosaic.version = 11 : i64} {
  func.func @_mean_pool_fast_kernel(%arg0: i32, %arg1: i32, %arg2: memref<1x4x256xf32, #tpu.memory_space<vmem>>, %arg3: memref<1x1x256xf32, #tpu.memory_space<vmem>>) attributes {dimension_semantics = [#tpu.dimension_semantics<parallel>, #tpu.dimension_semantics<parallel>], iteration_bounds = array<i64: 2, 1>, scalar_prefetch = 0 : i64, scratch_operands = 0 : i64, tpu.core_type = #tpu.core_type<tc>, window_params = [{transform_indices = @transform_0, window_bounds = array<i64: 1, 4, 256>}, {transform_indices = @transform_1, window_bounds = array<i64: 1, 1, 256>}]} {
    %c0 = arith.constant 0 : index
    %c0_0 = arith.constant 0 : index
    %c0_1 = arith.constant 0 : index
    %0 = vector.load %arg2[%c0, %c0_0, %c0_1] : memref<1x4x256xf32, #tpu.memory_space<vmem>>, vector<1x4x256xf32>
    %cst = arith.constant dense<0.000000e+00> : vector<1x256xf32>
    %1 = vector.multi_reduction <add>, %0, %cst [1] : vector<1x4x256xf32> to vector<1x256xf32>
    %2 = vector.shape_cast %1 : vector<1x256xf32> to vector<1x1x256xf32>
    %cst_2 = arith.constant 2.500000e-01 : f32
    %3 = vector.broadcast %cst_2 : f32 to vector<1x1x256xf32>
    %4 = arith.mulf %2, %3 : vector<1x1x256xf32>
    %c0_3 = arith.constant 0 : index
    %c0_4 = arith.constant 0 : index
    %c0_5 = arith.constant 0 : index
    %5 = vector.load %arg3[%c0_3, %c0_4, %c0_5] : memref<1x1x256xf32, #tpu.memory_space<vmem>>, vector<1x1x256xf32>
    tpu.vector_store %arg3[%c0_3, %c0_4, %c0_5], %4 {strides = array<i32>} : memref<1x1x256xf32, #tpu.memory_space<vmem>>, vector<1x1x256xf32>,
    return
  }
  func.func @transform_0(%arg0: i32, %arg1: i32) -> (i32, i32, i32) {
    %c0_i32 = arith.constant 0 : i32
    %c0_i32_0 = arith.constant 0 : i32
    return %arg0, %c0_i32, %arg1 : i32, i32, i32
  }
  func.func @transform_1(%arg0: i32, %arg1: i32) -> (i32, i32, i32) {
    %c0_i32 = arith.constant 0 : i32
    %c0_i32_0 = arith.constant 0 : i32
    return %arg0, %c0_i32, %arg1 : i32, i32, i32
  }
}

</mosaic_0001>

<bundles_post_ra>
// kernel: tpu_custom_call.1
= control target key start
LH: loop header
LB: loop body
LE: loop exit
PB: predicated region body
PF: predicated region fallthrough
CT: control target
= control target key end

     0   :  { %6 = vsyncpa [#allocation3], 0  ;;  %s637_s0 = inlined_call_operand.hbm [shape: f32[2,4,256], index: 0, kind: input, shape index: {}]   ;;  %s638_s1 = inlined_call_operand.hbm [shape: f32[2,1,256], index: 1, kind: output, shape index: {}]  }
   0x1   :  { %8 = vsyncpa [#allocation3 + $0x1], 0 }
   0x2   :  { %9 = vsyncpa [#allocation4], 0 }
   0x3   :  { %11 = vsyncpa [#allocation4 + $0x1], 0  ;;  %s502_s6 = smov 0   ;;  %s504_s7 = smov 0  }
   0x4   :  { %s506_s8 = smov 0   ;;  %s508_s9 = smov 0  }
   0x5   :  { %s510_s10 = smov 0   ;;  %s512_s11 = smov 0  }
   0x6 LB: > { %s298_s12 = sadd.s32 4294967295, %s487_s11   ;;  %s299_s13 = sadd.s32 4294967294, %s487_s11   ;;  %s487_s11 = sphi %s512_s11, %s17_s11   ;;  %s483_s10 = sphi %s510_s10, %s650_s10   ;;  %s479_s9 = sphi %s508_s9, %s649_s9   ;;  %s475_s8 = sphi %s506_s8, %s648_s8   ;;  %s471_s7 = sphi %s504_s7, %s647_s7   ;;  %s467_s6 = sphi %s502_s6, %s646_s6  }
   0x7   : > { %s29_s14 = sadd.s32 1, %s483_s10  ;;  %s38_s15 = sadd.s32 1, %s475_s8 }
   0x8   : > { %p31_p0 = scmp.ge.s32.totalorder %s29_s14, 2  ;;  %p45_p1 = scmp.ne.s32.totalorder %s475_s8, %s471_s7 }
   0x9   : > { %p46_p2 = scmp.eq.s32.totalorder %s487_s11, 0  ;;  %p51_p3 = scmp.ne.s32.totalorder %s471_s7, %s467_s6 }
   0xa   : > { %s652_s14 = smov (%p31_p0, %s29_s14), 0  ;;  %p52_p5 = scmp.eq.s32.totalorder %s298_s12, 0 }
   0xb   : > { %p543_p4 = por %p46_p2, %p45_p1  ;;  %s33_s17 = ssub.s32 %s483_s10, %s652_s14 }
   0xc   : > { %p77_p6 = scmp.eq.s32.totalorder %s298_s12, 1  ;;  %p36_p7 = scmp.eq.s32.totalorder %s33_s17, 0 }
   0xd   : > { %p549_p8 = por %p52_p5, %p51_p3  ;;  %p83_p10 = scmp.eq.s32.totalorder %s299_s13, 1 }
   0xe   : > { %p553_p9 = por %p77_p6, %p45_p1  ;;  %p327_p13 = scmp.lt.s32.totalorder %s487_s11, 2 }
   0xf   : > { %s558_s20 = scalar_select %p36_p7, %s475_s8, %s38_s15  }
  0x10   : > { %p560_p11 = por %p83_p10, %p51_p3  ;;  %s103_s22 = sand.u32 1, %s475_s8  }
  0x11   : > { %s302_s23 = sshll.u32 %s103_s22, 3  ;;  %s313_s24 = sshll.u32 %s483_s10, 7 }
  0x12   : > { %s642_s21 = scalar_select %p560_p11, 1, 0 }
  0x13   : > { %s115_s27 = scalar_lea.hbm %s637_s0, %s313_s24  ;;  %s107_s28 = scalar_lea.vmem [#allocation2], %s302_s23 }
  0x14   : > { %s117_s29 = sshll.u32 %s107_s28, 4  ;;  %p573_p0 = pnand %p327_p13, %p543_p4  ;;  %s118_s29 = int_to_ptr.vmem [resolvable:$true] %s117_s29 }
  0x15   : > { %p305_p1 = scmp.ge.s32.totalorder %s487_s11, 1  ;;  %p122_p2 = scmp.lt.s32.totalorder %s487_s11, 3 }
  0x16   : > { %s104_s2 = scalar_lea.sflag [#allocation3], %s103_s22  ;;  %p381_p3 = pneg %p573_p0 }
  0x17   : > { %s392_s3 = scalar_lea.vmem %s118_s29, 128  ;;  %s489_s4 = smov [#allocation2]  }
  0x18   : > { %p393_p5 = scmp.ne.s32.totalorder %s118_s29, %s392_s3  ;;  %s397_s5 = sshll.u32 %s489_s4, 4  ;;  %s398_s5 = int_to_ptr.vmem [resolvable:$false] %s397_s5 }
  0x19   : > { %s399_s12 = scalar_lea.vmem %s398_s5, 256  ;;  %p400_p10 = scmp.lt.s32.totalorder %s118_s29, %s398_s5 }
  0x1a   : > { %p395_p6 = pnand %p393_p5, %p381_p3  ;;  %p401_p12 = scmp.lt.s32.totalorder %s399_s12, %s392_s3 }
  0x1c   : > { %p396_p7 = pneg %p395_p6  ;;  %p402_p4 = por %p401_p12, %p400_p10 }
  0x1e   : > { %p403_p13 = pnand %p402_p4, %p396_p7 }
  0x20   : > { %406 = shalt.err (!%p403_p13)
}
  0x21   : > { %322 = dma.hbm_to_vmem [thread:$0]  (!%p573_p0), %s115_s27, 128, %s118_s29, %s104_s2  }
  0x22   : > { %p123_p11 = pnand %p305_p1, %p122_p2 }
  0x23   : > { %s588_s13 = sand.u32 (!%p123_p11), 1, %s471_s7  }
  0x24   : > { %126 = sbr.rel (%p123_p11) target bundleno = 79 (0x4f), region = 24  ;;  %s306_s15 = sshll.u32 (!%p123_p11), %s588_s13, 3 }
  0x25   : > { %s129_s16 = scalar_lea.sflag (!%p123_p11), [#allocation3], %s588_s13  ;;  %s132_s17 = scalar_lea.vmem (!%p123_p11), [#allocation2], %s306_s15 }
  0x29   : > { %458 = dma.done.wait (%p549_p8), %s129_s16, 128  }
  0x2a   : > { %460 = vsyncadd (%p549_p8), %s129_s16, 4294967168  ;;  %vm157_vm0 = vcmask 1043456   ;;  %v153_v0 = vld [vmem:[%s132_s17] sm:$0xff]  ;;  %v490_v11 = vmov 1966171168   ;;  %v180_v13 = vlaneseq  ;;  %s307_s18 = sshll.u32 %s588_s13, 1 }
  0x2b   : > { %v155_v1 = vcombine.high %v153_v0, %v153_v0  ;;  %v158_v2 = vsel %vm157_vm0, %v153_v0, 0.0  ;;  %v178_v12 = vunpack.c.l.s4 %v490_v11  ;;  %s150_s22 = scalar_lea.vmem [#allocation5], %s307_s18  ;;  %s314_s24 = sshll.u32 %s479_s9, 5 }
  0x2c   : > { %v159_v3 = vrot.slane %v158_v2, 4  ;;  %v181_v19 = vshrl.u32 %v180_v13, 7  ;;  %s214_s23 = sshll.u32 %s150_s22, 4  ;;  %vm194_vm1 = vcmp.lt.s32.totalorder %v180_v13, 256  ;;  %s212_s27 = scalar_lea.hbm %s638_s1, %s314_s24  ;;  %s215_s23 = int_to_ptr.vmem [resolvable:$true] %s214_s23 }
  0x2d   : > { %v165_v4 = vsel %vm157_vm0, %v155_v1, 0.0  ;;  %v179_v18 = vunpack.c.0.s8 %v178_v12  ;;  %s198_s28 = scalar_lea.sflag [#allocation4], %s588_s13  ;;  %s407_s29 = scalar_lea.vmem %s215_s23, 32 }
  0x2e   : > { %v160_v5 = vadd.f32 %v159_v3, %v158_v2  ;;  %v166_v6 = vrot.slane %v165_v4, 4  ;;  %p408_p8 = scmp.ne.s32.totalorder %s215_s23, %s407_s29  ;;  %s491_s30 = smov [#allocation5]  }
  0x2f   : > { %v182_v23 = vsub.s32 %v179_v18, %v181_v19  ;;  %s411_s2 = sshll.u32 %s491_s30, 4  ;;  %s412_s2 = int_to_ptr.vmem [resolvable:$false] %s411_s2 }
  0x30   : > { %v161_v7 = vrot.slane %v160_v5, 2  ;;  %v167_v8 = vadd.f32 %v166_v6, %v165_v4  ;;  %p409_p11 = pnand %p408_p8, %p553_p9  ;;  %s413_s3 = scalar_lea.vmem %s412_s2, 64 }
  0x31   : > { %p414_p0 = scmp.lt.s32.totalorder %s215_s23, %s412_s2  ;;  %p415_p1 = scmp.lt.s32.totalorder %s413_s3, %s407_s29 }
  0x32   : > { %v162_v9 = vadd.f32 %v161_v7, %v160_v5  ;;  %v168_v10 = vrot.slane %v167_v8, 2  ;;  %p410_p12 = pneg %p409_p11 }
  0x33   : > { %p416_p2 = por %p415_p1, %p414_p0 }
  0x34   : > { %v163_v14 = vrot.slane %v162_v9, 1  ;;  %v169_v15 = vadd.f32 %v168_v10, %v167_v8 }
  0x35   : > { %p417_p3 = pnand %p416_p2, %p410_p12 }
  0x36   : > { %v164_v16 = vadd.f32 %v163_v14, %v162_v9  ;;  %v170_v17 = vrot.slane %v169_v15, 1 }
  0x38   : > { %v171_v20 = vadd.f32 %v170_v17, %v169_v15  ;;  %v172_v21 = vmul.f32 0.25, %v164_v16 }
  0x3a   : > { %v173_v22 = vmul.f32 0.25, %v171_v20 }
  0x3c   : > { %v176_v24 = vcombine.low %v172_v21, %v173_v22 }
  0x3e   : > { %v183_v25 = vrot.slane %v176_v24, %v182_v23 }
  0x40   : > { %v190_v26 = vrot.slane %v183_v25, %v182_v23 }
  0x42   : > { %196 = vst.msk [vmem:[%s150_s22] sm:$0x3] %vm194_vm1, %v190_v26 }
  0x43   : > { %420 = shalt.err (!%p417_p3)
}
  0x44   : > { %s421_s9 = scalar_lea.hbm %s212_s27, 32  ;;  %s425_s12 = scalar_lea.hbm %s638_s1, 64 }
  0x45   : > { %p422_p5 = scmp.ne.s32.totalorder %s212_s27, %s421_s9  ;;  %p426_p10 = scmp.lt.s32.totalorder %s212_s27, %s638_s1 }
  0x46   : > { %p427_p4 = scmp.lt.s32.totalorder %s425_s12, %s421_s9 }
  0x47   : > { %p423_p6 = pnand %p422_p5, %p553_p9 }
  0x48   : > { %p428_p13 = por %p427_p4, %p426_p10 }
  0x49   : > { %p424_p7 = pneg %p423_p6 }
  0x4b   : > { %p429_p8 = pnand %p428_p13, %p424_p7 }
  0x4d   : > { %432 = shalt.err (!%p429_p8)
}
  0x4e   : > { %317 = dma.vmem_to_hbm [thread:$0]  (%p553_p9), %s215_s23, 32, %s212_s27, %s198_s28  }
  0x4f PF: > { %s226_s16 = sand.u32 1, %s467_s6   ;;  %p644_p11 = scmp.ne.s32.totalorder %s642_s21, 0 }
  0x50   : > { %p645_p12 = scmp.ge.s32.totalorder %s487_s11, 2  ;;  %s227_s17 = scalar_lea.sflag [#allocation4], %s226_s16 }
  0x52   : > { %p324_p0 = pnand %p645_p12, %p644_p11 }
  0x54   : > { %p325_p1 = pneg %p324_p0 }
  0x56   : > { %462 = dma.done.wait (%p325_p1), %s227_s17, 32  }
  0x57   : > { %464 = vsyncadd (%p325_p1), %s227_s17, 4294967264  ;;  %s17_s11 = sadd.s32 1, %s487_s11   ;;  %s646_s6 = smov %s471_s7 }
  0x58   : > { %p14_p2 = scmp.ge.s32.totalorder %s17_s11, 4   ;;  %s647_s7 = smov %s475_s8 }
  0x59   : > { %s648_s8 = smov %s558_s20  ;;  %s649_s9 = smov %s483_s10 }
  0x5a   : > { %s650_s10 = smov %s652_s14  ;;  %16 = sbr.rel (!%p14_p2) target bundleno = 6 (0x6), region = 69 }
  0x5f   :  { %232 = vsyncpa [#allocation3], 1 }
  0x60   :  { %234 = vsyncpa [#allocation3 + $0x1], 1 }
  0x61   :  { %235 = vsyncpa [#allocation4], 1 }
  0x62   :  { %237 = vsyncpa [#allocation4 + $0x1], 1 }

</bundles_post_ra>
